<compile_context>
chip_gen: v5e
topology: v5e:2x2
jax: 0.10.0
libtpu: 0.0.40
codegen_flags: <defaults>
</compile_context>

<pallas_src>
import functools

import numpy as np

import jax
import jax.numpy as jnp
from jax.experimental import pallas as pl
from jax.experimental.pallas import tpu as pltpu


def _round_up(x, m):
    return ((x + m - 1) // m) * m


# ----------------------------------------------------------------------------
# Kernel 1: projection.  x:(tm,K) bf16, w:(1,K,N) bf16, b:(1,N) f32 -> o:(1,tm,N)
# K (in_dim) is kept whole so there is no accumulator / reduction grid axis.
# ----------------------------------------------------------------------------
def _proj_kernel(x_ref, w_ref, b_ref, o_ref):
    acc = jnp.dot(x_ref[...], w_ref[0], preferred_element_type=jnp.float32)
    o_ref[0] = (acc + b_ref[...]).astype(o_ref.dtype)


# ----------------------------------------------------------------------------
# Kernel 2: per-step scores
#   scores[i, c, b, t] = sum_d xproj[i, t, b, d] * targets[t + i + offset, c, b, d]
# Grid = (time tiles j, steps i).  Targets main block depends only on j (reused
# across the inner steps sweep).  The halo scratch holds the last hd rows of the
# current tile ++ the first hd rows of the next tile so the dynamic shift never
# reads out of the block.
# ----------------------------------------------------------------------------
def _scores_kernel(xp_ref, tga_ref, tgb_ref, out_ref, halo_ref, *, offset, hd, copies):
    i = pl.program_id(1)            # prediction step
    shift = i + offset              # dynamic scalar, offset <= shift <= hd
    tt = tga_ref.shape[0]
    t_main = tt - hd

    # Refill halo once per time tile; it persists across the inner steps sweep.
    @pl.when(i == 0)
    def _():
        halo_ref[0:hd] = tga_ref[t_main:tt]
        halo_ref[hd:2 * hd] = tgb_ref[...]

    # Static loop over the small copies axis keeps live f32 temporaries bounded
    # at (tile, bsz, dim) instead of (tile, copies, bsz, dim).
    for c in range(copies):
        # main rows: local t in [0, t_main) -> target rows [shift, shift+t_main)
        xp_m = xp_ref[0, 0:t_main, :, :].astype(jnp.float32)
        tg_m = tga_ref[pl.ds(shift, t_main), c, :, :].astype(jnp.float32)
        s_m = jnp.sum(xp_m * tg_m, axis=-1)                       # (t_main, bsz)
        out_ref[0, c, :, 0:t_main] = jnp.transpose(s_m, (1, 0))   # lane-dense store

        # tail rows: local t in [t_main, tt) -> targets come from the halo buffer
        xp_t = xp_ref[0, t_main:tt, :, :].astype(jnp.float32)
        tg_t = halo_ref[pl.ds(shift, hd), c, :, :].astype(jnp.float32)
        s_t = jnp.sum(xp_t * tg_t, axis=-1)                       # (hd, bsz)
        out_ref[0, c, :, t_main:tt] = jnp.transpose(s_t, (1, 0))


# ----------------------------------------------------------------------------
# Forward pass
# ----------------------------------------------------------------------------
def wav2vec_predictions_forward(
    x, y, conv_weight, conv_bias, neg_key, *,
    prediction_steps, n_negatives, offset, balanced_classes,
    time_tile=256,                      # scores time tile upper bound (128 is a good v7x choice)
    proj_row_tile=512,                  # projection row tile over bsz*tsz
    scores_vmem_budget=36 * 1024 * 1024,
    compute_dtype=jnp.bfloat16,
):
    bsz, in_dim, tsz = x.shape
    fsz = y.shape[1]
    out_dim = conv_weight.shape[1]
    assert fsz == out_dim
    copies = 1 + n_negatives
    steps = min(prediction_steps, tsz - offset)
    assert steps >= 1
    isz = jnp.dtype(compute_dtype).itemsize

    # --- negative sampling (XLA glue; matches the reference module: uniform in
    # [0, tsz), per-batch, cross_sample_negatives=False, sample_distance=None).
    # Built directly in the kernel's (time, copies, batch, feature) layout so
    # the big `targets` tensor never needs an extra transpose pass.
    y_t = jnp.transpose(y, (2, 0, 1))                                   # (tsz, bsz, fsz)
    neg_idxs = jax.random.randint(neg_key, (bsz, n_negatives * tsz), 0, tsz)
    idx_tnb = jnp.transpose(neg_idxs.reshape(bsz, n_negatives, tsz), (2, 1, 0))
    negs_t = y_t[idx_tnb, jnp.arange(bsz)[None, None, :], :]            # (tsz, n_neg, bsz, fsz)
    targets_t = jnp.concatenate([y_t[:, None], negs_t], axis=1)         # (tsz, copies, bsz, fsz)

    # --- scores-kernel tiling (time tile tt, halo depth hd) ---
    max_shift = offset + steps - 1
    hd = pl.next_power_of_2(max(max_shift, 1))      # power of two -> divides the aligned tile

    def _scores_blk_bytes(tt_):
        xb = tt_ * bsz * out_dim * isz               # xproj block
        ta = tt_ * copies * bsz * out_dim * isz      # targets main block
        tb = hd * copies * bsz * out_dim * isz       # targets halo block
        ob = copies * bsz * tt_ * 4                  # f32 output block
        sc = 2 * hd * copies * bsz * out_dim * isz   # halo scratch (single buffered)
        return 2 * (xb + ta + tb + ob) + sc          # x2 for double buffering

    align = max(hd, 128)                             # hd | align (hd is a power of two)
    tt_full = max(2 * hd, _round_up(tsz, hd))
    if tt_full <= time_tile and _scores_blk_bytes(tt_full) <= scores_vmem_budget:
        tt = tt_full                                 # single time tile (block == full axis)
    else:
        tt = max(2 * hd, _round_up(min(time_tile, tsz), align))
        while _scores_blk_bytes(tt) > scores_vmem_budget and tt > max(2 * hd, align):
            tt = max(align, ((tt // 2) // align) * align)
        tt = max(tt, 2 * hd)
    n_tt = pl.cdiv(tsz, tt)
    tsz_out = n_tt * tt                              # padded time extent of xproj / scores
    tsz_tgt = tsz_out + hd                           # padded time extent of targets

    # --- projection inputs: x -> (time, batch, feature) rows, bf16 ---
    x_t = jnp.transpose(x, (2, 0, 1))                                   # (tsz, bsz, in_dim)
    x_t = jnp.pad(x_t, ((0, tsz_out - tsz), (0, 0), (0, 0)))
    M_pad = tsz_out * bsz
    x2d = x_t.reshape(M_pad, in_dim).astype(compute_dtype)
    w_k = jnp.transpose(conv_weight[:, :, 0, :], (2, 0, 1))[:steps].astype(compute_dtype)
    b2d = conv_bias.reshape(1, out_dim).astype(jnp.float32)

    tm = M_pad if M_pad <= proj_row_tile else proj_row_tile
    n_m = pl.cdiv(M_pad, tm)
    proj_bytes = 2 * (tm * in_dim * isz + in_dim * out_dim * isz
                      + out_dim * 4 + tm * out_dim * isz)
    proj_cost = pl.CostEstimate(
        flops=2 * M_pad * in_dim * out_dim * steps,
        transcendentals=0,
        bytes_accessed=int(M_pad * in_dim * isz + steps * in_dim * out_dim * isz
                           + steps * M_pad * out_dim * isz))

    xproj_flat = pl.pallas_call(
        _proj_kernel,
        out_shape=jax.ShapeDtypeStruct((steps, M_pad, out_dim), compute_dtype),
        grid=(n_m, steps),                           # rows outer -> x block reused across steps
        in_specs=[
            pl.BlockSpec((tm, in_dim), lambda m, s: (m, 0)),
            pl.BlockSpec((1, in_dim, out_dim), lambda m, s: (s, 0, 0)),
            pl.BlockSpec((1, out_dim), lambda m, s: (0, 0)),
        ],
        out_specs=pl.BlockSpec((1, tm, out_dim), lambda m, s: (s, m, 0)),
        compiler_params=pltpu.CompilerParams(
            dimension_semantics=("parallel", "parallel"),
            vmem_limit_bytes=int(min(max(proj_bytes + (8 << 20), 32 << 20), 96 << 20)),
        ),
        cost_estimate=proj_cost,
    )(x2d, w_k, b2d)
    # nn.Dropout: identity (eval mode).
    xproj_k = xproj_flat.reshape(steps, tsz_out, bsz, out_dim)          # free reshape

    # --- targets in kernel layout, bf16, zero-padded along time by (tsz_out-tsz)+hd ---
    targets_k = jnp.pad(targets_t.astype(compute_dtype),
                        ((0, tsz_tgt - tsz), (0, 0), (0, 0), (0, 0)))

    scores_bytes = _scores_blk_bytes(tt)
    scores_cost = pl.CostEstimate(
        flops=2 * steps * tsz_out * copies * bsz * out_dim,
        transcendentals=0,
        bytes_accessed=int(steps * tsz_out * bsz * out_dim * isz
                           + tsz_tgt * copies * bsz * out_dim * isz
                           + steps * copies * bsz * tsz_out * 4))

    scores = pl.pallas_call(
        functools.partial(_scores_kernel, offset=offset, hd=hd, copies=copies),
        out_shape=jax.ShapeDtypeStruct((steps, copies, bsz, tsz_out), jnp.float32),
        grid=(n_tt, steps),    # time tiles outer; steps inner reuses the resident targets tile
        in_specs=[
            pl.BlockSpec((1, tt, bsz, out_dim), lambda j, i: (i, j, 0, 0)),
            pl.BlockSpec((tt, copies, bsz, out_dim), lambda j, i: (j, 0, 0, 0)),
            pl.BlockSpec((hd, copies, bsz, out_dim),
                         lambda j, i: ((j + 1) * (tt // hd), 0, 0, 0)),
        ],
        out_specs=pl.BlockSpec((1, copies, bsz, tt), lambda j, i: (i, 0, 0, j)),
        scratch_shapes=[pltpu.VMEM((2 * hd, copies, bsz, out_dim), compute_dtype)],
        compiler_params=pltpu.CompilerParams(
            # time-tile axis is 'parallel' (megacore split on v7x); the inner steps
            # axis is 'arbitrary' so the targets tile stays resident and is reused.
            dimension_semantics=("parallel", "arbitrary"),
            vmem_limit_bytes=int(min(max(scores_bytes + (8 << 20), 32 << 20), 96 << 20)),
        ),
        cost_estimate=scores_cost,
    )(xproj_k, targets_k, targets_k)

    # --- ragged assembly: one static gather; labels/weights are constants ---
    # Per step i the valid segment is scores[i, :, :, :tsz-(i+offset)] flattened
    # in (copies, bsz, t) order -- exactly the PyTorch flatten order.
    idx_chunks, lab_chunks, w_chunks = [], [], []
    for i in range(steps):
        off = i + offset
        valid_t = tsz - off
        base = i * copies * bsz * tsz_out
        c_i = np.arange(copies, dtype=np.int64)[:, None, None]
        b_i = np.arange(bsz, dtype=np.int64)[None, :, None]
        t_i = np.arange(valid_t, dtype=np.int64)[None, None, :]
        idx_chunks.append((base + (c_i * bsz + b_i) * tsz_out + t_i).reshape(-1))
        seg_len = copies * bsz * valid_t
        pos_num = bsz * valid_t
        lab = np.zeros(seg_len, np.float32)
        lab[:pos_num] = 1.0
        lab_chunks.append(lab)
        if balanced_classes:
            w = np.full(seg_len, 1.0 / n_negatives, np.float32)
            w[:pos_num] = 1.0
            w_chunks.append(w)

    gather_idx = jnp.asarray(np.concatenate(idx_chunks).astype(np.int32))
    predictions = scores.reshape(-1)[gather_idx]
    labels = jnp.asarray(np.concatenate(lab_chunks))

    expected = (bsz * copies * (tsz - offset + 1) * steps
                - (steps + 1) * steps // 2 * copies * bsz)
    assert predictions.shape[0] == expected, (predictions.shape[0], expected)

    if balanced_classes:
        return predictions, (labels, jnp.asarray(np.concatenate(w_chunks)))
    return predictions, labels


# ----------------------------------------------------------------------------
# Pure-JAX f32 reference (for a correctness check against the Pallas path)
# ----------------------------------------------------------------------------
def _reference_predictions(x, y, conv_weight, conv_bias, neg_key, *,
                           prediction_steps, n_negatives, offset):
    bsz, in_dim, tsz = x.shape
    fsz = y.shape[1]
    y_flat = jnp.transpose(y, (1, 0, 2)).reshape(fsz, bsz * tsz)
    neg_idxs = jax.random.randint(neg_key, (bsz, n_negatives * tsz), 0, tsz)
    neg_idxs = neg_idxs + (jnp.arange(bsz) * tsz)[:, None]
    negs = y_flat[:, neg_idxs.reshape(-1)].reshape(
        fsz, bsz, n_negatives, tsz).transpose(2, 1, 0, 3)
    targets = jnp.concatenate([y[None], negs], axis=0)           # (copies, bsz, fsz, tsz)
    xproj = jnp.einsum("bct,cos->bots", x, conv_weight[:, :, 0, :],
                       precision=jax.lax.Precision.HIGHEST)
    xproj = xproj + conv_bias[None, :, None, None]                # (b, d, t, s)
    steps = min(prediction_steps, tsz - offset)
    preds = []
    for i in range(steps):
        off = i + offset
        seg = jnp.sum(xproj[None, :, :, : tsz - off, i] * targets[:, :, :, off:], axis=2)
        preds.append(seg.reshape(-1))
    return jnp.concatenate(preds)


if __name__ == "__main__":
    key = jax.random.PRNGKey(0)
    k_x, k_y, k_w, k_b, k_neg = jax.random.split(key, 5)

    # Small, forward-consistent shapes.
    bsz, in_dim, out_dim, tsz = 2, 16, 32, 16
    prediction_steps, n_negatives, offset = 4, 3, 1
    balanced_classes = True

    x = jax.random.normal(k_x, (bsz, in_dim, tsz), jnp.float32)
    y = jax.random.normal(k_y, (bsz, out_dim, tsz), jnp.float32)
    conv_weight = 0.1 * jax.random.normal(
        k_w, (in_dim, out_dim, 1, prediction_steps), jnp.float32)
    conv_bias = 0.1 * jax.random.normal(k_b, (out_dim,), jnp.float32)

    predictions, (labels, weights) = wav2vec_predictions_forward(
        x, y, conv_weight, conv_bias, k_neg,
        prediction_steps=prediction_steps, n_negatives=n_negatives,
        offset=offset, balanced_classes=balanced_classes)
    jax.block_until_ready(predictions)

    ref = _reference_predictions(
        x, y, conv_weight, conv_bias, k_neg,
        prediction_steps=prediction_steps, n_negatives=n_negatives, offset=offset)
    assert predictions.shape == ref.shape
    assert labels.shape == predictions.shape and weights.shape == predictions.shape
    # bf16 MXU/VPU compute vs f32 reference -> loose tolerance.
    assert bool(jnp.allclose(predictions, ref, rtol=5e-2, atol=5e-2)), "mismatch vs reference"

    print("KERNEL_OK")
</pallas_src>

<mosaic_0001>
module attributes {stable_mosaic.version = 11 : i64} {
  func.func @_proj_kernel(%arg0: i32, %arg1: i32, %arg2: memref<32x16xbf16, #tpu.memory_space<vmem>>, %arg3: memref<1x16x32xbf16, #tpu.memory_space<vmem>>, %arg4: memref<1x32xf32, #tpu.memory_space<vmem>>, %arg5: memref<1x32x32xbf16, #tpu.memory_space<vmem>>) attributes {dimension_semantics = [#tpu.dimension_semantics<parallel>, #tpu.dimension_semantics<parallel>], iteration_bounds = array<i64: 1, 4>, scalar_prefetch = 0 : i64, scratch_operands = 0 : i64, tpu.core_type = #tpu.core_type<tc>, window_params = [{transform_indices = @transform_0, window_bounds = array<i64: 32, 16>}, {transform_indices = @transform_1, window_bounds = array<i64: 1, 16, 32>}, {pipeline_mode = #tpu.pipeline_mode<synchronous>, transform_indices = @transform_2, window_bounds = array<i64: 1, 32>}, {transform_indices = @transform_3, window_bounds = array<i64: 1, 32, 32>}]} {
    %c0 = arith.constant 0 : index
    %c0_0 = arith.constant 0 : index
    %0 = vector.load %arg2[%c0, %c0_0] : memref<32x16xbf16, #tpu.memory_space<vmem>>, vector<32x16xbf16>
    %c0_1 = arith.constant 0 : index
    %c0_2 = arith.constant 0 : index
    %c0_3 = arith.constant 0 : index
    %1 = vector.load %arg3[%c0_1, %c0_2, %c0_3] : memref<1x16x32xbf16, #tpu.memory_space<vmem>>, vector<1x16x32xbf16>
    %2 = vector.shape_cast %1 : vector<1x16x32xbf16> to vector<16x32xbf16>
    %cst = arith.constant dense<0.000000e+00> : vector<32x32xf32>
    %3 = tpu.matmul %0, %2, %cst {dimension_numbers = #tpu.dot_dimension_numbers<[1], [0], [0], [1], [0, 0, 1, 1], [], []>} : vector<32x16xbf16>, vector<16x32xbf16>, vector<32x32xf32> -> vector<32x32xf32>
    %c0_4 = arith.constant 0 : index
    %c0_5 = arith.constant 0 : index
    %4 = vector.load %arg4[%c0_4, %c0_5] : memref<1x32xf32, #tpu.memory_space<vmem>>, vector<1x32xf32>
    %5 = vector.broadcast %4 : vector<1x32xf32> to vector<32x32xf32>
    %6 = arith.addf %3, %5 : vector<32x32xf32>
    %7 = arith.truncf %6 : vector<32x32xf32> to vector<32x32xbf16>
    %c0_6 = arith.constant 0 : index
    %c0_7 = arith.constant 0 : index
    %c0_8 = arith.constant 0 : index
    %8 = vector.load %arg5[%c0_6, %c0_7, %c0_8] : memref<1x32x32xbf16, #tpu.memory_space<vmem>>, vector<1x32x32xbf16>
    %9 = vector.shape_cast %8 : vector<1x32x32xbf16> to vector<32x32xbf16>
    %10 = vector.shape_cast %7 : vector<32x32xbf16> to vector<1x32x32xbf16>
    tpu.vector_store %arg5[%c0_6, %c0_7, %c0_8], %10 {strides = array<i32>} : memref<1x32x32xbf16, #tpu.memory_space<vmem>>, vector<1x32x32xbf16>,
    return
  }
  func.func @transform_0(%arg0: i32, %arg1: i32) -> (i32, i32) {
    %c0_i32 = arith.constant 0 : i32
    %c0_i32_0 = arith.constant 0 : i32
    return %arg0, %c0_i32 : i32, i32
  }
  func.func @transform_1(%arg0: i32, %arg1: i32) -> (i32, i32, i32) {
    %c0_i32 = arith.constant 0 : i32
    %c0_i32_0 = arith.constant 0 : i32
    %c0_i32_1 = arith.constant 0 : i32
    return %arg1, %c0_i32, %c0_i32_0 : i32, i32, i32
  }
  func.func @transform_2(%arg0: i32, %arg1: i32) -> (i32, i32) {
    %c0_i32 = arith.constant 0 : i32
    %c0_i32_0 = arith.constant 0 : i32
    %c0_i32_1 = arith.constant 0 : i32
    return %c0_i32, %c0_i32_0 : i32, i32
  }
  func.func @transform_3(%arg0: i32, %arg1: i32) -> (i32, i32, i32) {
    %c0_i32 = arith.constant 0 : i32
    %c0_i32_0 = arith.constant 0 : i32
    return %arg1, %arg0, %c0_i32 : i32, i32, i32
  }
}

</mosaic_0001>

<bundles_post_ra>
// kernel: tpu_custom_call.1
= control target key start
LH: loop header
LB: loop body
LE: loop exit
PB: predicated region body
PF: predicated region fallthrough
CT: control target
= control target key end

     0   :  { %8 = vsyncpa [#allocation3], 0  ;;  %s780_s0 = inlined_call_operand.vmem [shape: bf16[32,16], index: 0, kind: input, shape index: {}]   ;;  %s781_s1 = inlined_call_operand.hbm [shape: bf16[4,16,32], index: 1, kind: input, shape index: {}]   ;;  %s782_s2 = inlined_call_operand.vmem [shape: f32[1,32], index: 2, kind: input, shape index: {}]   ;;  %s783_s3 = inlined_call_operand.hbm [shape: bf16[4,32,32], index: 3, kind: output, shape index: {}]  }
   0x1   :  { %10 = vsyncpa [#allocation3 + $0x1], 0 }
   0x2   :  { %11 = vsyncpa [#allocation4], 0 }
   0x3   :  { %13 = vsyncpa [#allocation4 + $0x1], 0  ;;  %s648_s12 = smov 0   ;;  %s650_s13 = smov 0  }
   0x4   :  { %s652_s14 = smov 0   ;;  %s654_s15 = smov 0  }
   0x5   :  { %s656_s16 = smov 0   ;;  %s658_s17 = smov 0  }
   0x6 LB: > { %s407_s18 = sadd.s32 4294967295, %s622_s17   ;;  %s408_s19 = sadd.s32 4294967294, %s622_s17   ;;  %s622_s17 = sphi %s658_s17, %s19_s17   ;;  %s618_s16 = sphi %s656_s16, %s792_s16   ;;  %s614_s15 = sphi %s654_s15, %s791_s15   ;;  %s610_s14 = sphi %s652_s14, %s790_s14   ;;  %s606_s13 = sphi %s650_s13, %s789_s13   ;;  %s602_s12 = sphi %s648_s12, %s788_s12  }
   0x7   : > { %s28_s20 = sadd.s32 1, %s618_s16  ;;  %s64_s21 = sadd.s32 1, %s610_s14 }
   0x8   : > { %p29_p0 = scmp.ge.s32.totalorder %s28_s20, 4  ;;  %p71_p1 = scmp.ne.s32.totalorder %s610_s14, %s606_s13 }
   0x9   : > { %p72_p2 = scmp.eq.s32.totalorder %s622_s17, 0  ;;  %p77_p3 = scmp.ne.s32.totalorder %s606_s13, %s602_s12 }
   0xa   : > { %s794_s20 = smov (%p29_p0, %s28_s20), 0  ;;  %p78_p5 = scmp.eq.s32.totalorder %s407_s18, 0 }
   0xb   : > { %p689_p4 = por %p72_p2, %p71_p1  ;;  %s61_s23 = ssub.s32 %s618_s16, %s794_s20 }
   0xc   : > { %p124_p6 = scmp.eq.s32.totalorder %s407_s18, 3  ;;  %p62_p7 = scmp.eq.s32.totalorder %s61_s23, 0 }
   0xd   : > { %p695_p8 = por %p78_p5, %p77_p3  ;;  %p130_p10 = scmp.eq.s32.totalorder %s408_s19, 3 }
   0xe   : > { %p699_p9 = por %p124_p6, %p71_p1  ;;  %p455_p12 = scmp.lt.s32.totalorder %s622_s17, 4 }
   0xf   : > { %s704_s26 = scalar_select %p62_p7, %s610_s14, %s64_s21  }
  0x10   : > { %p706_p11 = por %p130_p10, %p77_p3  ;;  %s162_s28 = sand.u32 1, %s610_s14  }
  0x11   : > { %s412_s29 = sshll.u32 %s162_s28, 3  ;;  %s437_s30 = sshll.u32 %s618_s16, 3 }
  0x12   : > { %s171_s6 = scalar_lea.hbm %s781_s1, %s437_s30  ;;  %s166_s7 = scalar_lea.vmem [#allocation2], %s412_s29 }
  0x13   : > { %s174_s8 = sshll.u32 %s166_s7, 4  ;;  %s172_s9 = sshll.u32 %s171_s6, 4  ;;  %s175_s8 = int_to_ptr.vmem [resolvable:$true] %s174_s8  ;;  %s173_s9 = int_to_ptr.hbm [resolvable:$true] %s172_s9 }
  0x14   : > { %p448_p13 = pnand %p455_p12, %p689_p4  ;;  %p415_p0 = scmp.ge.s32.totalorder %s622_s17, 1 }
  0x15   : > { %s163_s10 = scalar_lea.sflag [#allocation3], %s162_s28  ;;  %s624_s11 = smov 64  }
  0x16   : > { %s625_s18 = smov 4   ;;  %p182_p1 = scmp.lt.s32.totalorder %s622_s17, 5 }
  0x17   : > { %450 = dma.hbm_to_vmem [thread:$0]  (!%p448_p13), %s173_s9, 128, %s175_s8, %s163_s10, %s624_s11, %s624_s11, %s625_s18  }
  0x18   : > { %p183_p2 = pnand %p415_p0, %p182_p1 }
  0x19   : > { %s721_s19 = sand.u32 (!%p183_p2), 1, %s606_s13  }
  0x1a   : > { %186 = sbr.rel (%p183_p2) target bundleno = 179 (0xb3), region = 32  ;;  %s416_s21 = sshll.u32 (!%p183_p2), %s721_s19, 3 }
  0x1b   : > { %s189_s23 = scalar_lea.sflag (!%p183_p2), [#allocation3], %s721_s19  ;;  %s192_s29 = scalar_lea.vmem (!%p183_p2), [#allocation2], %s416_s21 }
  0x1f   : > { %593 = dma.done.wait (%p695_p8), %s189_s23, 128  }
  0x20   : > { %595 = vsyncadd (%p695_p8), %s189_s23, 4294967168  ;;  %v440_v0 = vld [vmem:[%s192_s29] sm:$0xff]  ;;  %vm255_vm0 = vcmask 130048   ;;  %s417_s24 = sshll.u32 %s721_s19, 4  ;;  %vm285_vm1 = vcmask 257024   ;;  %s441_s7 = sshll.u32 %s614_s15, 4 }
  0x21   : > { %v438_v1 = vld [vmem:[%s780_s0] sm:$0xff]  ;;  %v439_v2 = vld [vmem:[%s780_s0 + $0x8] sm:$0xff]  ;;  %269 = vmatpush.bf16.msra.mxu0 %v440_v0  ;;  %442 = vmatpush.bf16.msra.mxu1 %v440_v0  ;;  %s220_s8 = scalar_lea.vmem [#allocation5], %s417_s24  ;;  %s304_s11 = scalar_lea.hbm %s783_s3, %s441_s7 }
  0x22   : > { %v509_v3 = vld [vmem:[%s782_s2] ss:$0 sm:$0xff]  ;;  %s305_s18 = sshll.u32 %s220_s8, 4  ;;  %s307_s21 = sshll.u32 %s304_s11, 4  ;;  %s306_s18 = int_to_ptr.vmem [resolvable:$true] %s305_s18  ;;  %s308_s21 = int_to_ptr.hbm [resolvable:$true] %s307_s21 }
  0x23   : > { %s291_s15 = scalar_lea.sflag [#allocation4], %s721_s19  ;;  %s554_s23 = sshra.s32 %s308_s21, 4  ;;  %s555_s23 = int_to_ptr.hbm [resolvable:$true] %s554_s23 }
  0x24   : > { %430 = vmatmul.msk.bf16.vlgmr.msra.gmra.mxu0 %vm255_vm0, %v438_v1  ;;  %431 = vmatmul.msk.bf16.vlgmr.msra.gmra.mxu1 %vm255_vm0, %v439_v2  ;;  %s556_s29 = scalar_lea.hbm %s555_s23, 16  ;;  %s560_s30 = scalar_lea.hbm %s783_s3, 64 }
  0x25   : > { %p557_p3 = scmp.ne.s32.totalorder %s555_s23, %s556_s29  ;;  %p561_p6 = scmp.lt.s32.totalorder %s555_s23, %s783_s3 }
  0x26   : > { %p562_p7 = scmp.lt.s32.totalorder %s560_s30, %s556_s29 }
  0x27   : > { %p558_p4 = pnand %p557_p3, %p699_p9 }
  0x28   : > { %p563_p8 = por %p562_p7, %p561_p6 }
  0x29   : > { %p559_p5 = pneg %p558_p4 }
  0x2b   : > { %p564_p10 = pnand %p563_p8, %p559_p5 }
  0xa1   : > { %v271_v4 = vpop.f32.mrf.mxu0  ;;  %v276_v5 = vpop.f32.mrf.mxu1 }
  0xa2   : > { %v272_v6 = vadd.f32 %v509_v3, %v271_v4  ;;  %v277_v7 = vadd.f32 %v509_v3, %v276_v5 }
  0xa4   : > { %v281_v8 = vpack.c.bf16 %v272_v6, %v272_v6  ;;  %v283_v9 = vpack.c.bf16 %v277_v7, %v277_v7 }
  0xa6   : > { %286 = vst.msk [vmem:[%s220_s8] sm:$0xf] %vm285_vm1, %v281_v8 }
  0xa7   : > { %288 = vst.msk [vmem:[%s220_s8 + $0x8] sm:$0xf] %vm285_vm1, %v283_v9 }
  0xa9   : > { %v273_v10 = vpop.f32.mrf.mxu0  ;;  %v278_v11 = vpop.f32.mrf.mxu1 }
  0xaa   : > { %v274_v12 = vadd.f32 %v509_v3, %v273_v10  ;;  %v279_v13 = vadd.f32 %v509_v3, %v278_v11 }
  0xac   : > { %v282_v14 = vpack.c.bf16 %v274_v12, %v274_v12  ;;  %v284_v15 = vpack.c.bf16 %v279_v13, %v279_v13 }
  0xae   : > { %287 = vst.msk [vmem:[%s220_s8 + $0x4] sm:$0xf] %vm285_vm1, %v282_v14 }
  0xaf   : > { %289 = vst.msk [vmem:[%s220_s8 + $0xc] sm:$0xf] %vm285_vm1, %v284_v15 }
  0xb0   : > { %567 = shalt.err (!%p564_p10)
}
  0xb1   : > { %s626_s19 = smov 64   ;;  %s627_s6 = smov 4  }
  0xb2   : > { %445 = dma.vmem_to_hbm [thread:$0]  (%p699_p9), %s306_s18, 256, %s308_s21, %s291_s15, %s626_s19, %s626_s19, %s627_s6  }
  0xb3 PF: > { %p456_p12 = scmp.ge.s32.totalorder %s622_s17, 2  ;;  %s322_s24 = sand.u32 1, %s602_s12  }
  0xb4   : > { %s323_s7 = scalar_lea.sflag [#allocation4], %s322_s24 }
  0xb5   : > { %p452_p13 = pnand %p456_p12, %p706_p11 }
  0xb7   : > { %p453_p0 = pneg %p452_p13 }
  0xb9   : > { %597 = dma.done.wait (%p453_p0), %s323_s7, 256  }
  0xba   : > { %599 = vsyncadd (%p453_p0), %s323_s7, 4294967040  ;;  %s19_s17 = sadd.s32 1, %s622_s17   ;;  %s788_s12 = smov %s606_s13 }
  0xbb   : > { %p16_p1 = scmp.ge.s32.totalorder %s19_s17, 6   ;;  %s789_s13 = smov %s610_s14 }
  0xbc   : > { %s790_s14 = smov %s704_s26  ;;  %s791_s15 = smov %s618_s16 }
  0xbd   : > { %s792_s16 = smov %s794_s20  ;;  %18 = sbr.rel (!%p16_p1) target bundleno = 6 (0x6), region = 80 }
  0xc2   :  { %329 = vsyncpa [#allocation3], 1 }
  0xc3   :  { %331 = vsyncpa [#allocation3 + $0x1], 1 }
  0xc4   :  { %332 = vsyncpa [#allocation4], 1 }
  0xc5   :  { %334 = vsyncpa [#allocation4 + $0x1], 1 }

</bundles_post_ra>
